<compile_context>
chip_gen: v7x
topology: tpu7x:2x2x1
jax: 0.10.0
libtpu: 0.0.40
codegen_flags: <defaults>
</compile_context>

<pallas_src>
import functools

import jax
import jax.numpy as jnp
from jax import lax
from jax.experimental import pallas as pl
from jax.experimental.pallas import tpu as pltpu


def autopad(k, p=None):
    if p is None:
        p = k // 2 if isinstance(k, int) else [x // 2 for x in k]
    return p


def _round_up(x, m):
    return ((x + m - 1) // m) * m


# ----------------------------- Pallas kernel --------------------------------
def _conv_bn_silu_kernel(p_ref, w_ref, bias_ref, o_ref, acc_ref):
    # p_ref:    (tm, tk)  bf16 im2col rows (K-slice)
    # w_ref:    (tk, tn)  bf16 flattened conv weight with BN scale folded in
    # bias_ref: (1, tn)   f32 BN folded bias = beta - mean * scale
    # o_ref:    (tm, tn)  f32 output tile
    # acc_ref:  (tm, tn)  f32 accumulator scratch (resident across the K axis)
    kk = pl.program_id(2)

    @pl.when(kk == 0)
    def _():
        acc_ref[...] = jnp.zeros_like(acc_ref)

    acc_ref[...] += jnp.dot(p_ref[...], w_ref[...],
                            preferred_element_type=jnp.float32)

    @pl.when(kk == pl.num_programs(2) - 1)
    def _():
        y = acc_ref[...] + bias_ref[...]
        # SiLU: y * sigmoid(y); exp + approx reciprocal both ride the EUP slot.
        sig = pl.reciprocal(1.0 + jnp.exp(-y), approx=True)
        o_ref[...] = (y * sig).astype(o_ref.dtype)


def _fused_matmul_bias_silu(patches, w_scaled, bias):
    """patches (M, K) bf16, w_scaled (K, C2) bf16, bias (1, C2) f32 -> (M, C2) f32."""
    M, Kdim = patches.shape
    _, C2 = w_scaled.shape

    # ---- tile selection -----------------------------------------------------
    tm = 512 if M >= 512 else (256 if M >= 256 else 128)
    tn = 256 if C2 > 256 else 128            # lane-dense output (>=128)
    tk = Kdim if Kdim <= 2048 else 1024      # tile the reduction only when large

    M_pad = _round_up(M, tm)
    C2_pad = _round_up(C2, tn)
    K_pad = _round_up(Kdim, tk)

    if (M_pad, K_pad) != (M, Kdim):
        patches = jnp.pad(patches, ((0, M_pad - M), (0, K_pad - Kdim)))
    if (K_pad, C2_pad) != (Kdim, C2):
        w_scaled = jnp.pad(w_scaled, ((0, K_pad - Kdim), (0, C2_pad - C2)))
    if C2_pad != C2:
        bias = jnp.pad(bias, ((0, 0), (0, C2_pad - C2)))

    grid = (M_pad // tm, C2_pad // tn, K_pad // tk)

    # VMEM footprint estimate (double-buffered bf16 inputs, f32 out + accumulator).
    vmem_est = (2 * tm * tk * 2 + 2 * tk * tn * 2 + 2 * tn * 4
                + 2 * tm * tn * 4 + tm * tn * 4)
    vmem_limit = min(64 * 1024 * 1024, max(2 * vmem_est, 16 * 1024 * 1024))

    out = pl.pallas_call(
        _conv_bn_silu_kernel,
        out_shape=jax.ShapeDtypeStruct((M_pad, C2_pad), jnp.float32),
        grid_spec=pltpu.PrefetchScalarGridSpec(
            num_scalar_prefetch=0,
            grid=grid,
            in_specs=[
                pl.BlockSpec((tm, tk), lambda i, j, kk: (i, kk)),
                pl.BlockSpec((tk, tn), lambda i, j, kk: (kk, j)),
                pl.BlockSpec((1, tn), lambda i, j, kk: (0, j)),
            ],
            out_specs=pl.BlockSpec((tm, tn), lambda i, j, kk: (i, j)),
            scratch_shapes=[pltpu.VMEM((tm, tn), jnp.float32)],
        ),
        compiler_params=pltpu.CompilerParams(
            dimension_semantics=("parallel", "parallel", "arbitrary"),
            vmem_limit_bytes=vmem_limit,
        ),
    )(patches, w_scaled, bias)
    return out[:M, :C2]


# ------------------------------ Conv module ---------------------------------
class Conv:
    """JAX/Pallas port of yolov5 Conv (g=1). BN uses inference (running-stat) semantics."""

    def __init__(self, c1, c2, k=1, s=1, p=None, g=1, act=True, key=None):
        assert g == 1  # TODO(synk): grouped convolution (g > 1) not implemented
        self.c1, self.c2, self.k, self.s = c1, c2, k, s
        self.p = autopad(k, p)
        self.act = act
        key = jax.random.PRNGKey(0) if key is None else key
        kw, kg, kb, km, kv = jax.random.split(key, 5)
        # deterministic synthetic parameters (shapes match nn.Conv2d / nn.BatchNorm2d)
        fan_in = c1 * k * k
        self.weight = jax.random.normal(kw, (c2, c1, k, k), jnp.float32) / jnp.sqrt(fan_in)
        self.gamma = 1.0 + 0.1 * jax.random.normal(kg, (c2,), jnp.float32)
        self.beta = 0.1 * jax.random.normal(kb, (c2,), jnp.float32)
        self.running_mean = 0.1 * jax.random.normal(km, (c2,), jnp.float32)
        self.running_var = 1.0 + 0.1 * jax.random.uniform(kv, (c2,), jnp.float32)
        self.eps = 1e-5  # nn.BatchNorm2d default (matches the given spec)

    # ---- patch extraction in NHWC (kh, kw, c1 ordering along K) -------------
    def _patches_nhwc(self, x):
        N, H, W, C1 = x.shape
        k, s, p = self.k, self.s, self.p
        OH = (H + 2 * p - k) // s + 1
        OW = (W + 2 * p - k) // s + 1
        if k == 1 and p == 0:
            xs = x[:, ::s, ::s, :] if s > 1 else x
            pat = xs.reshape(N * OH * OW, C1)
        else:
            # TODO(synk): fuse halo-strip extraction into the kernel (pl.ANY + manual
            # DMA) to avoid the k*k im2col HBM inflation; for now emit bf16 patches.
            xp = jnp.pad(x, ((0, 0), (p, p), (p, p), (0, 0)))
            cols = [xp[:, kh:kh + s * OH:s, kw:kw + s * OW:s, :]
                    for kh in range(k) for kw in range(k)]        # each (N,OH,OW,C1)
            pat = jnp.stack(cols, axis=3)                         # (N,OH,OW,k*k,C1)
            pat = pat.reshape(N * OH * OW, k * k * C1)
        return pat.astype(jnp.bfloat16), (N, OH, OW)

    def forward_nhwc(self, x_nhwc):
        patches, (N, OH, OW) = self._patches_nhwc(x_nhwc)
        k = self.k
        # weight (C2, C1, kh, kw) -> (kh, kw, c1, C2) -> (k*k*C1, C2): matches patch order
        w_flat = jnp.transpose(self.weight, (2, 3, 1, 0)).reshape(k * k * self.c1, self.c2)
        scale = self.gamma / jnp.sqrt(self.running_var + self.eps)
        bias = (self.beta - self.running_mean * scale).reshape(1, -1).astype(jnp.float32)
        w_scaled = (w_flat * scale[None, :]).astype(jnp.bfloat16)   # fold BN scale
        out = _fused_matmul_bias_silu(patches, w_scaled, bias)       # (M, C2) f32
        return out.reshape(N, OH, OW, self.c2)

    def __call__(self, x):
        # x: (N, C1, H, W) float32; public API stays NCHW like the PyTorch module.
        if self.act is not True:
            # TODO(synk): custom act modules not supported; True -> SiLU (fused in kernel)
            raise NotImplementedError
        x_nhwc = jnp.transpose(x, (0, 2, 3, 1))
        out_nhwc = self.forward_nhwc(x_nhwc)
        return jnp.transpose(out_nhwc, (0, 3, 1, 2))                 # NCHW


# ------------------------------ reference -----------------------------------
def _reference(module, x):
    y = lax.conv_general_dilated(
        x, module.weight, window_strides=(module.s, module.s),
        padding=[(module.p, module.p)] * 2,
        dimension_numbers=("NCHW", "OIHW", "NCHW"))
    scale = module.gamma / jnp.sqrt(module.running_var + module.eps)
    bias = module.beta - module.running_mean * scale
    y = y * scale[None, :, None, None] + bias[None, :, None, None]
    return y * jax.nn.sigmoid(y)


if __name__ == "__main__":
    key = jax.random.PRNGKey(0)
    kx, kp1, kp2, kp3 = jax.random.split(key, 4)
    N, C1, C2, H, W = 2, 4, 8, 16, 16
    x = jax.random.normal(kx, (N, C1, H, W), jnp.float32)

    # 3x3 stride-1 (the common YOLOv5 conv)
    conv3 = Conv(C1, C2, k=3, s=1, key=kp1)
    out3 = jax.block_until_ready(conv3(x))
    ref3 = _reference(conv3, x)
    assert out3.shape == (N, C2, H, W), out3.shape
    assert jnp.allclose(out3, ref3, atol=3e-2, rtol=3e-2), float(jnp.max(jnp.abs(out3 - ref3)))

    # 1x1 pointwise conv (exercises the no-im2col fast path)
    conv1 = Conv(C1, C2, k=1, s=1, key=kp2)
    out1 = jax.block_until_ready(conv1(x))
    ref1 = _reference(conv1, x)
    assert out1.shape == (N, C2, H, W), out1.shape
    assert jnp.allclose(out1, ref1, atol=3e-2, rtol=3e-2), float(jnp.max(jnp.abs(out1 - ref1)))

    # 3x3 stride-2 downsample conv
    conv_s2 = Conv(C1, C2, k=3, s=2, key=kp3)
    out_s2 = jax.block_until_ready(conv_s2(x))
    ref_s2 = _reference(conv_s2, x)
    assert out_s2.shape == (N, C2, H // 2, W // 2), out_s2.shape
    assert jnp.allclose(out_s2, ref_s2, atol=3e-2, rtol=3e-2), float(jnp.max(jnp.abs(out_s2 - ref_s2)))

    print("KERNEL_OK")
</pallas_src>

<mosaic_0001>
module attributes {stable_mosaic.version = 11 : i64} {
  func.func @_conv_bn_silu_kernel(%arg0: i32, %arg1: i32, %arg2: i32, %arg3: memref<512x36xbf16, #tpu.memory_space<vmem>>, %arg4: memref<36x128xbf16, #tpu.memory_space<vmem>>, %arg5: memref<1x128xf32, #tpu.memory_space<vmem>>, %arg6: memref<512x128xf32, #tpu.memory_space<vmem>>, %arg7: memref<512x128xf32, #tpu.memory_space<vmem>>) attributes {dimension_semantics = [#tpu.dimension_semantics<parallel>, #tpu.dimension_semantics<parallel>, #tpu.dimension_semantics<arbitrary>], iteration_bounds = array<i64: 1, 1, 1>, scalar_prefetch = 0 : i64, scratch_operands = 1 : i64, tpu.core_type = #tpu.core_type<tc>, window_params = [{transform_indices = @transform_0, window_bounds = array<i64: 512, 36>}, {transform_indices = @transform_1, window_bounds = array<i64: 36, 128>}, {transform_indices = @transform_2, window_bounds = array<i64: 1, 128>}, {transform_indices = @transform_3, window_bounds = array<i64: 512, 128>}]} {
    %c0_i32 = arith.constant 0 : i32
    %0 = arith.cmpi eq, %arg2, %c0_i32 : i32
    %1 = arith.extui %0 : i1 to i32
    %c0_i32_0 = arith.constant 0 : i32
    %2 = arith.cmpi ne, %1, %c0_i32_0 : i32
    scf.if %2 {
      %cst_10 = arith.constant 0.000000e+00 : f32
      %12 = vector.broadcast %cst_10 : f32 to vector<512x128xf32>
      %c0_11 = arith.constant 0 : index
      %c0_12 = arith.constant 0 : index
      %13 = vector.load %arg7[%c0_11, %c0_12] : memref<512x128xf32, #tpu.memory_space<vmem>>, vector<512x128xf32>
      tpu.vector_store %arg7[%c0_11, %c0_12], %12 {strides = array<i32>} : memref<512x128xf32, #tpu.memory_space<vmem>>, vector<512x128xf32>,
    } else {
    }
    %c0 = arith.constant 0 : index
    %c0_1 = arith.constant 0 : index
    %3 = vector.load %arg7[%c0, %c0_1] : memref<512x128xf32, #tpu.memory_space<vmem>>, vector<512x128xf32>
    %c0_2 = arith.constant 0 : index
    %c0_3 = arith.constant 0 : index
    %4 = vector.load %arg3[%c0_2, %c0_3] : memref<512x36xbf16, #tpu.memory_space<vmem>>, vector<512x36xbf16>
    %c0_4 = arith.constant 0 : index
    %c0_5 = arith.constant 0 : index
    %5 = vector.load %arg4[%c0_4, %c0_5] : memref<36x128xbf16, #tpu.memory_space<vmem>>, vector<36x128xbf16>
    %cst = arith.constant dense<0.000000e+00> : vector<512x128xf32>
    %6 = tpu.matmul %4, %5, %cst {dimension_numbers = #tpu.dot_dimension_numbers<[1], [0], [0], [1], [0, 0, 1, 1], [], []>} : vector<512x36xbf16>, vector<36x128xbf16>, vector<512x128xf32> -> vector<512x128xf32>
    %7 = arith.addf %3, %6 : vector<512x128xf32>
    %c0_6 = arith.constant 0 : index
    %c0_7 = arith.constant 0 : index
    %8 = vector.load %arg7[%c0_6, %c0_7] : memref<512x128xf32, #tpu.memory_space<vmem>>, vector<512x128xf32>
    tpu.vector_store %arg7[%c0_6, %c0_7], %7 {strides = array<i32>} : memref<512x128xf32, #tpu.memory_space<vmem>>, vector<512x128xf32>,
    %c0_i32_8 = arith.constant 0 : i32
    %9 = arith.cmpi eq, %arg2, %c0_i32_8 : i32
    %10 = arith.extui %9 : i1 to i32
    %c0_i32_9 = arith.constant 0 : i32
    %11 = arith.cmpi ne, %10, %c0_i32_9 : i32
    scf.if %11 {
      %c0_10 = arith.constant 0 : index
      %c0_11 = arith.constant 0 : index
      %12 = vector.load %arg7[%c0_10, %c0_11] : memref<512x128xf32, #tpu.memory_space<vmem>>, vector<512x128xf32>
      %c0_12 = arith.constant 0 : index
      %c0_13 = arith.constant 0 : index
      %13 = vector.load %arg5[%c0_12, %c0_13] : memref<1x128xf32, #tpu.memory_space<vmem>>, vector<1x128xf32>
      %14 = vector.broadcast %13 : vector<1x128xf32> to vector<512x128xf32>
      %15 = arith.addf %12, %14 : vector<512x128xf32>
      %cst_14 = arith.constant 0.000000e+00 : f32
      %16 = vector.broadcast %cst_14 : f32 to vector<512x128xf32>
      %17 = arith.subf %16, %15 : vector<512x128xf32>
      %18 = math.exp %17 : vector<512x128xf32>
      %cst_15 = arith.constant 1.000000e+00 : f32
      %19 = vector.broadcast %cst_15 : f32 to vector<512x128xf32>
      %20 = arith.addf %19, %18 : vector<512x128xf32>
      %21 = tpu.reciprocal %20 {approx = true} : vector<512x128xf32> -> vector<512x128xf32>
      %22 = arith.mulf %15, %21 : vector<512x128xf32>
      %c0_16 = arith.constant 0 : index
      %c0_17 = arith.constant 0 : index
      %23 = vector.load %arg6[%c0_16, %c0_17] : memref<512x128xf32, #tpu.memory_space<vmem>>, vector<512x128xf32>
      tpu.vector_store %arg6[%c0_16, %c0_17], %22 {strides = array<i32>} : memref<512x128xf32, #tpu.memory_space<vmem>>, vector<512x128xf32>,
    } else {
    }
    return
  }
  func.func @transform_0(%arg0: i32, %arg1: i32, %arg2: i32) -> (i32, i32) {
    %c0_i32 = arith.constant 0 : i32
    return %arg0, %arg2 : i32, i32
  }
  func.func @transform_1(%arg0: i32, %arg1: i32, %arg2: i32) -> (i32, i32) {
    %c0_i32 = arith.constant 0 : i32
    return %arg2, %arg1 : i32, i32
  }
  func.func @transform_2(%arg0: i32, %arg1: i32, %arg2: i32) -> (i32, i32) {
    %c0_i32 = arith.constant 0 : i32
    %c0_i32_0 = arith.constant 0 : i32
    return %c0_i32, %arg1 : i32, i32
  }
  func.func @transform_3(%arg0: i32, %arg1: i32, %arg2: i32) -> (i32, i32) {
    %c0_i32 = arith.constant 0 : i32
    return %arg0, %arg1 : i32, i32
  }
}

</mosaic_0001>

<bundles_post_ra>
// kernel: tpu_custom_call.1
= control target key start
LH: loop header
LB: loop body
LE: loop exit
PB: predicated region body
PF: predicated region fallthrough
CT: control target
= control target key end

     0   :  { %vm392_vm0 = vcmask 293888   ;;  %vm489_vm1 = vcmask 1041408   ;;  %s2616_s0 = inlined_call_operand.vmem [shape: bf16[512,36], index: 0, kind: input, shape index: {}]   ;;  %s2617_s1 = inlined_call_operand.vmem [shape: bf16[36,128], index: 1, kind: input, shape index: {}]   ;;  %s2618_s2 = inlined_call_operand.vmem [shape: f32[1,128], index: 2, kind: input, shape index: {}]   ;;  %s2619_s3 = inlined_call_operand.hbm [shape: f32[512,128], index: 3, kind: output, shape index: {}]  }
   0x1   :  { %v1696_v0 = vld [vmem:[%s2617_s1] sm:$0xff]   ;;  %v1697_v1 = vld [vmem:[%s2617_s1 + $0x8] sm:$0xff]   ;;  %v1698_v2 = vld [vmem:[%s2617_s1 + $0x10] ss:$0 sps:$4 sm:$0x33]  }
   0x2   :  { %1615 = vmatprep.subr.bf16.mxu0 %v1696_v0  ;;  %1685 = vmatprep.subr.bf16.mxu1 %v1696_v0  ;;  %v1699_v3 = vld [vmem:[%s2616_s0] sm:$0xff]   ;;  %v491_v5 = vsel %vm489_vm1, %v1698_v2, 0  ;;  %v1701_v6 = vld [vmem:[%s2616_s0 + $0x8] sm:$0xff]   ;;  %v1703_v8 = vld [vmem:[%s2616_s0 + $0x10] sm:$0xff]  }
   0x3   :  { %1616 = vmatpush3.bf16.msra.mxu0 %v1696_v0  ;;  %1688 = vmatpush3.bf16.msra.mxu1 %v1696_v0  ;;  %v1700_v4 = vld [vmem:[%s2616_s0 + $0x80] sm:$0xff]   ;;  %v1702_v7 = vld [vmem:[%s2616_s0 + $0x88] sm:$0xff]   ;;  %v1704_v9 = vld [vmem:[%s2616_s0 + $0x90] sm:$0xff]  }
   0x4   :  { %1617 = vmatprep.subr.bf16.mxu0 %v1697_v1  ;;  %1686 = vmatprep.subr.bf16.mxu1 %v1697_v1  ;;  %v1705_v10 = vld [vmem:[%s2616_s0 + $0x18] sm:$0xff]   ;;  %v1707_v12 = vld [vmem:[%s2616_s0 + $0x20] sm:$0xff]   ;;  %v1709_v14 = vld [vmem:[%s2616_s0 + $0x28] sm:$0xff]  }
   0x5   :  { %1621 = vmatprep.mubr.msk.bf16.mxu0 %vm392_vm0, %v1699_v3  ;;  %1653 = vmatprep.mubr.msk.bf16.mxu1 %vm392_vm0, %v1700_v4  ;;  %v1706_v11 = vld [vmem:[%s2616_s0 + $0x98] sm:$0xff]   ;;  %v1708_v13 = vld [vmem:[%s2616_s0 + $0xa0] sm:$0xff]   ;;  %v1710_v15 = vld [vmem:[%s2616_s0 + $0xa8] sm:$0xff]  }
   0x6   :  { %v1711_v16 = vld [vmem:[%s2616_s0 + $0x30] sm:$0xff]   ;;  %v1713_v18 = vld [vmem:[%s2616_s0 + $0x38] sm:$0xff]  }
   0x7   :  { %1618 = vmatpush3.bf16.msra.mxu0 %v1697_v1  ;;  %1689 = vmatpush3.bf16.msra.mxu1 %v1697_v1  ;;  %v1712_v17 = vld [vmem:[%s2616_s0 + $0xb0] sm:$0xff]   ;;  %v1714_v19 = vld [vmem:[%s2616_s0 + $0xb8] sm:$0xff]  }
   0x8   :  { %1691 = vmatprep.subr.msk.bf16.mxu0 %vm489_vm1, %v1698_v2  ;;  %1692 = vmatprep.subr.msk.bf16.mxu1 %vm489_vm1, %v1698_v2 }
   0xb   :  { %1620 = vmatpush3.bf16.msra.mxu0 %v491_v5  ;;  %1690 = vmatpush3.bf16.msra.mxu1 %v491_v5 }
   0xe   :  { %1622 = vmatmul.mubr.msk.bf16.vlgmr.msra.gmra.mrb[0].mxu0 %vm392_vm0, %v1701_v6  ;;  %1654 = vmatmul.mubr.msk.bf16.vlgmr.msra.gmra.mrb[0].mxu1 %vm392_vm0, %v1702_v7 }
   0xf   :  { %1625 = vmatprep.mubr.msk.bf16.mxu0 %vm392_vm0, %v1703_v8  ;;  %1657 = vmatprep.mubr.msk.bf16.mxu1 %vm392_vm0, %v1704_v9 }
  0x16   :  { %1626 = vmatmul.mubr.msk.bf16.gmra.mrb[4].mxu0 %vm392_vm0, %v1705_v10  ;;  %1658 = vmatmul.mubr.msk.bf16.gmra.mrb[4].mxu1 %vm392_vm0, %v1706_v11 }
  0x17   :  { %1629 = vmatprep.mubr.msk.bf16.mxu0 %vm392_vm0, %v1707_v12  ;;  %1661 = vmatprep.mubr.msk.bf16.mxu1 %vm392_vm0, %v1708_v13 }
  0x1e   :  { %1630 = vmatmul.mubr.msk.bf16.gmra.mrb[8].mxu0 %vm392_vm0, %v1709_v14  ;;  %1662 = vmatmul.mubr.msk.bf16.gmra.mrb[8].mxu1 %vm392_vm0, %v1710_v15 }
  0x1f   :  { %1633 = vmatprep.mubr.msk.bf16.mxu0 %vm392_vm0, %v1711_v16  ;;  %1665 = vmatprep.mubr.msk.bf16.mxu1 %vm392_vm0, %v1712_v17 }
  0x20   :  { %8 = vsyncpa [#allocation4], 0  ;;  %v1715_v20 = vld [vmem:[%s2616_s0 + $0x40] sm:$0xff]   ;;  %v1717_v22 = vld [vmem:[%s2616_s0 + $0x48] sm:$0xff]  }
  0x21   :  { %v1716_v21 = vld [vmem:[%s2616_s0 + $0xc0] sm:$0xff]   ;;  %v1718_v23 = vld [vmem:[%s2616_s0 + $0xc8] sm:$0xff]   ;;  %v1719_v24 = vld [vmem:[%s2616_s0 + $0x50] sm:$0xff]  }
  0x22   :  { %v1720_v25 = vld [vmem:[%s2616_s0 + $0xd0] sm:$0xff]   ;;  %v1721_v26 = vld [vmem:[%s2616_s0 + $0x58] sm:$0xff]   ;;  %v1723_v28 = vld [vmem:[%s2616_s0 + $0x60] sm:$0xff]  }
  0x23   :  { %v1722_v27 = vld [vmem:[%s2616_s0 + $0xd8] sm:$0xff]   ;;  %v1724_v29 = vld [vmem:[%s2616_s0 + $0xe0] sm:$0xff]   ;;  %v1725_v30 = vld [vmem:[%s2616_s0 + $0x68] sm:$0xff]  }
  0x24   :  { %v1726_v31 = vld [vmem:[%s2616_s0 + $0xe8] sm:$0xff]   ;;  %v1727_v32 = vld [vmem:[%s2616_s0 + $0x70] sm:$0xff]   ;;  %v1729_v34 = vld [vmem:[%s2616_s0 + $0x78] sm:$0xff]  }
  0x25   :  { %v1728_v33 = vld [vmem:[%s2616_s0 + $0xf0] sm:$0xff]   ;;  %v1730_v35 = vld [vmem:[%s2616_s0 + $0xf8] sm:$0xff]   ;;  %v2175_v36 = vld [vmem:[%s2618_s2] ss:$0 sm:$0xff] }
  0x26   :  { %1634 = vmatmul.mubr.msk.bf16.gmra.mrb[12].mxu0 %vm392_vm0, %v1713_v18  ;;  %1666 = vmatmul.mubr.msk.bf16.gmra.mrb[12].mxu1 %vm392_vm0, %v1714_v19 }
  0x27   :  { %1637 = vmatprep.mubr.msk.bf16.mxu0 %vm392_vm0, %v1715_v20  ;;  %1669 = vmatprep.mubr.msk.bf16.mxu1 %vm392_vm0, %v1716_v21 }
  0x2e   :  { %1638 = vmatmul.mubr.msk.bf16.gmra.mrb[16].mxu0 %vm392_vm0, %v1717_v22  ;;  %1670 = vmatmul.mubr.msk.bf16.gmra.mrb[16].mxu1 %vm392_vm0, %v1718_v23 }
  0x2f   :  { %1641 = vmatprep.mubr.msk.bf16.mxu0 %vm392_vm0, %v1719_v24  ;;  %1673 = vmatprep.mubr.msk.bf16.mxu1 %vm392_vm0, %v1720_v25 }
  0x36   :  { %1642 = vmatmul.mubr.msk.bf16.gmra.mrb[20].mxu0 %vm392_vm0, %v1721_v26  ;;  %1674 = vmatmul.mubr.msk.bf16.gmra.mrb[20].mxu1 %vm392_vm0, %v1722_v27 }
  0x37   :  { %1645 = vmatprep.mubr.msk.bf16.mxu0 %vm392_vm0, %v1723_v28  ;;  %1677 = vmatprep.mubr.msk.bf16.mxu1 %vm392_vm0, %v1724_v29 }
  0x3e   :  { %1646 = vmatmul.mubr.msk.bf16.gmra.mrb[24].mxu0 %vm392_vm0, %v1725_v30  ;;  %1678 = vmatmul.mubr.msk.bf16.gmra.mrb[24].mxu1 %vm392_vm0, %v1726_v31 }
  0x3f   :  { %1649 = vmatprep.mubr.msk.bf16.mxu0 %vm392_vm0, %v1727_v32  ;;  %1681 = vmatprep.mubr.msk.bf16.mxu1 %vm392_vm0, %v1728_v33 }
  0x46   :  { %1650 = vmatmul.mubr.msk.bf16.gmra.mrb[28].mxu0 %vm392_vm0, %v1729_v34  ;;  %1682 = vmatmul.mubr.msk.bf16.gmra.mrb[28].mxu1 %vm392_vm0, %v1730_v35 }
  0xe1   :  { %v1623_v37 = vpop.f32.mrb[0].mxu0  ;;  %v1655_v38 = vpop.f32.mrb[0].mxu1 }
  0xe2   :  { %v2178_v39 = vadd.f32 %v1623_v37, %v2175_v36  ;;  %v2181_v40 = vadd.f32 %v1655_v38, %v2175_v36  ;;  %v527_v41 = vpop.f32.mrb[1].mxu0  ;;  %v655_v42 = vpop.f32.mrb[1].mxu1 }
  0xe3   :  { %v2184_v43 = vadd.f32 %v2175_v36, %v527_v41  ;;  %v2187_v44 = vadd.f32 %v2175_v36, %v655_v42  ;;  %v1624_v45 = vpop.f32.mrb[2].mxu0  ;;  %v1656_v46 = vpop.f32.mrb[2].mxu1 }
  0xe4   :  { %v1050_v47 = vsub.f32 0.0, %v2178_v39  ;;  %v1082_v48 = vsub.f32 0.0, %v2181_v40  ;;  %v2192_v49 = vadd.f32 %v1624_v45, %v2175_v36  ;;  %v2195_v50 = vadd.f32 %v1656_v46, %v2175_v36  ;;  %v530_v51 = vpop.f32.mrb[3].mxu0  ;;  %v658_v52 = vpop.f32.mrb[3].mxu1 }
  0xe5   :  { %v1048_v53 = vsub.f32 0.0, %v2184_v43  ;;  %v1080_v54 = vsub.f32 0.0, %v2187_v44  ;;  %v2200_v55 = vadd.f32 %v2175_v36, %v530_v51  ;;  %v2203_v56 = vadd.f32 %v2175_v36, %v658_v52 }
  0xe6   :  { %v1116_v57 = vmul.f32 1.442695, %v1050_v47  ;;  %v1180_v58 = vmul.f32 1.442695, %v1082_v48  ;;  %v1051_v59 = vsub.f32 0.0, %v2192_v49  ;;  %v1083_v60 = vsub.f32 0.0, %v2195_v50 }
  0xe7   :  { %v1112_v61 = vmul.f32 1.442695, %v1048_v53  ;;  %v1176_v62 = vmul.f32 1.442695, %v1080_v54  ;;  %v1049_v63 = vsub.f32 0.0, %v2200_v55  ;;  %v1081_v0 = vsub.f32 0.0, %v2203_v56 }
  0xe8   :  { %1731 = vpow2.f32 %v1116_v57  ;;  %v1118_v1 = vmul.f32 1.442695, %v1051_v59  ;;  %v1182_v2 = vmul.f32 1.442695, %v1083_v60 }
  0xe9   :  { %1733 = vpow2.f32 %v1180_v58  ;;  %v1627_v3 = vpop.f32.mrb[4].mxu0  ;;  %v1659_v4 = vpop.f32.mrb[4].mxu1  ;;  %v1114_v5 = vmul.f32 1.442695, %v1049_v63  ;;  %v1178_v10 = vmul.f32 1.442695, %v1081_v0 }
  0xea   :  { %1735 = vpow2.f32 %v1112_v61  ;;  %v2210_v6 = vadd.f32 %v1627_v3, %v2175_v36  ;;  %v2213_v7 = vadd.f32 %v1659_v4, %v2175_v36  ;;  %v543_v8 = vpop.f32.mrb[5].mxu0  ;;  %v671_v9 = vpop.f32.mrb[5].mxu1 }
  0xeb   :  { %1737 = vpow2.f32 %v1176_v62  ;;  %v2216_v11 = vadd.f32 %v2175_v36, %v543_v8  ;;  %v2219_v12 = vadd.f32 %v2175_v36, %v671_v9  ;;  %v1628_v13 = vpop.f32.mrb[6].mxu0  ;;  %v1660_v14 = vpop.f32.mrb[6].mxu1 }
  0xec   :  { %1739 = vpow2.f32 %v1118_v1  ;;  %v1054_v15 = vsub.f32 0.0, %v2210_v6  ;;  %v1086_v16 = vsub.f32 0.0, %v2213_v7  ;;  %v2224_v17 = vadd.f32 %v1628_v13, %v2175_v36  ;;  %v546_v18 = vpop.f32.mrb[7].mxu0  ;;  %v674_v19 = vpop.f32.mrb[7].mxu1 }
  0xed   :  { %1741 = vpow2.f32 %v1182_v2  ;;  %v1052_v20 = vsub.f32 0.0, %v2216_v11  ;;  %v1084_v21 = vsub.f32 0.0, %v2219_v12  ;;  %v2230_v31 = vadd.f32 %v1660_v14, %v2175_v36 }
  0xee   :  { %1743 = vpow2.f32 %v1114_v5  ;;  %v1124_v22 = vmul.f32 1.442695, %v1054_v15  ;;  %v1188_v23 = vmul.f32 1.442695, %v1086_v16  ;;  %v1055_v24 = vsub.f32 0.0, %v2224_v17 }
  0xef   :  { %1745 = vpow2.f32 %v1178_v10  ;;  %v1120_v25 = vmul.f32 1.442695, %v1052_v20  ;;  %v1184_v26 = vmul.f32 1.442695, %v1084_v21  ;;  %v2233_v37 = vadd.f32 %v2175_v36, %v546_v18 }
  0xf0   :  { %1747 = vpow2.f32 %v1124_v22  ;;  %v1126_v27 = vmul.f32 1.442695, %v1055_v24  ;;  %v2236_v46 = vadd.f32 %v2175_v36, %v674_v19  ;;  %v1087_v57 = vsub.f32 0.0, %v2230_v31 }
  0xf1   :  { %1749 = vpow2.f32 %v1188_v23  ;;  %v1631_v28 = vpop.f32.mrb[8].mxu0  ;;  %v1663_v29 = vpop.f32.mrb[8].mxu1  ;;  %v1053_v61 = vsub.f32 0.0, %v2233_v37 }
  0xf2   :  { %v1732_v30 = vpop.eup %1731  ;;  %1751 = vpow2.f32 %v1120_v25  ;;  %v559_v32 = vpop.f32.mrb[9].mxu0  ;;  %v2240_v58 = vadd.f32 %v1631_v28, %v2175_v36  ;;  %v2244_v62 = vadd.f32 %v1663_v29, %v2175_v36  ;;  %v1085_v1 = vsub.f32 0.0, %v2236_v46 }
  0xf3   :  { %v687_v33 = vpop.f32.mrb[9].mxu1  ;;  %v1734_v34 = vpop.eup %1733  ;;  %v1242_v35 = vadd.f32 1.0, %v1732_v30  ;;  %1753 = vpow2.f32 %v1184_v26  ;;  %v2248_v4 = vadd.f32 %v2175_v36, %v559_v32  ;;  %v1190_v13 = vmul.f32 1.442695, %v1087_v57 }
  0xf4   :  { %v1632_v38 = vpop.f32.mrb[10].mxu0  ;;  %v1664_v41 = vpop.f32.mrb[10].mxu1  ;;  %v1274_v45 = vadd.f32 1.0, %v1734_v34  ;;  %1755 = vpow2.f32 %v1126_v27  ;;  %v1058_v14 = vsub.f32 0.0, %v2240_v58  ;;  %v1122_v20 = vmul.f32 1.442695, %v1053_v61 }
  0xf5   :  { %v1736_v42 = vpop.eup %1735  ;;  %v562_v47 = vpop.f32.mrb[11].mxu0  ;;  %1757 = vrcp.f32 %v1242_v35  ;;  %v1090_v21 = vsub.f32 0.0, %v2244_v62  ;;  %v1186_v26 = vmul.f32 1.442695, %v1085_v1  ;;  %v2261_v27 = vadd.f32 %v2175_v36, %v687_v33 }
  0xf6   :  { %v1738_v48 = vpop.eup %1737  ;;  %v1240_v51 = vadd.f32 1.0, %v1736_v42  ;;  %v690_v52 = vpop.f32.mrb[11].mxu1  ;;  %1759 = vrcp.f32 %v1274_v45  ;;  %v1056_v34 = vsub.f32 0.0, %v2248_v4  ;;  %v2269_v35 = vadd.f32 %v1632_v38, %v2175_v36 }
  0xf7   :  { %v1740_v53 = vpop.eup %1739  ;;  %v1272_v54 = vadd.f32 1.0, %v1738_v48  ;;  %v1132_v48 = vmul.f32 1.442695, %v1058_v14  ;;  %v2275_v57 = vadd.f32 %v2175_v36, %v562_v47  ;;  %v1088_v38 = vsub.f32 0.0, %v2261_v27 }
  0xf8   :  { %v1742_v59 = vpop.eup %1741  ;;  %1761 = vrcp.f32 %v1240_v51  ;;  %v1243_v60 = vadd.f32 1.0, %v1740_v53  ;;  %v2272_v51 = vadd.f32 %v1664_v41, %v2175_v36  ;;  %v2280_v61 = vadd.f32 %v2175_v36, %v690_v52 }
  0xf9   :  { %v1744_v63 = vpop.eup %1743  ;;  %1763 = vrcp.f32 %v1272_v54  ;;  %v1275_v0 = vadd.f32 1.0, %v1742_v59  ;;  %v1635_v5 = vpop.f32.mrb[12].mxu0  ;;  %v1196_v54 = vmul.f32 1.442695, %v1090_v21 }
  0xfa   :  { %v1746_v2 = vpop.eup %1745  ;;  %1765 = vrcp.f32 %v1243_v60  ;;  %v1241_v3 = vadd.f32 1.0, %v1744_v63  ;;  %v1667_v8 = vpop.f32.mrb[12].mxu1  ;;  %v2285_v1 = vadd.f32 %v1635_v5, %v2175_v36  ;;  %v1091_v52 = vsub.f32 0.0, %v2272_v51 }
  0xfb   :  { %v1748_v9 = vpop.eup %1747  ;;  %1767 = vrcp.f32 %v1275_v0  ;;  %v1273_v10 = vadd.f32 1.0, %v1746_v2  ;;  %v2251_v15 = vpop.f32.mrb[13].mxu0  ;;  %v1059_v0 = vsub.f32 0.0, %v2269_v35 }
  0xfc   :  { %v2253_v16 = vpop.f32.mrb[13].mxu1  ;;  %v1750_v18 = vpop.eup %1749  ;;  %1769 = vrcp.f32 %v1241_v3  ;;  %v1246_v19 = vadd.f32 1.0, %v1748_v9  ;;  %v2294_v9 = vadd.f32 %v1667_v8, %v2175_v36 }
  0xfd   :  { %v2256_v22 = vpop.f32.mrb[14].mxu0  ;;  %v2258_v23 = vpop.f32.mrb[14].mxu1  ;;  %1771 = vrcp.f32 %v1273_v10  ;;  %v1278_v25 = vadd.f32 1.0, %v1750_v18  ;;  %v1128_v18 = vmul.f32 1.442695, %v1056_v34 }
  0xfe   :  { %v1752_v24 = vpop.eup %1751  ;;  %v2263_v28 = vpop.f32.mrb[15].mxu0  ;;  %1773 = vrcp.f32 %v1246_v19  ;;  %v1057_v19 = vsub.f32 0.0, %v2275_v57  ;;  %v1134_v34 = vmul.f32 1.442695, %v1059_v0 }
  0xff   :  { %v2265_v29 = vpop.f32.mrb[15].mxu1  ;;  %v1754_v30 = vpop.eup %1753  ;;  %v1244_v32 = vadd.f32 1.0, %v1752_v24  ;;  %1775 = vrcp.f32 %v1278_v25  ;;  %v1192_v24 = vmul.f32 1.442695, %v1088_v38  ;;  %v1089_v25 = vsub.f32 0.0, %v2280_v61 }
 0x100   :  { %v1756_v42 = vpop.eup %1755  ;;  %v1276_v45 = vadd.f32 1.0, %v1754_v30 }
 0x101   :  { %v1758_v33 = vpop.eup %1757  ;;  %1777 = vrcp.f32 %v1244_v32  ;;  %v1247_v53 = vadd.f32 1.0, %v1756_v42  ;;  %v2287_v47 = vpop.f32.mrb[16].mxu0  ;;  %v1062_v42 = vsub.f32 0.0, %v2285_v1 }
 0x102   :  { %v1760_v59 = vpop.eup %1759  ;;  %v1370_v60 = vmul.f32 %v1758_v33, %v2178_v39  ;;  %1779 = vrcp.f32 %v1276_v45  ;;  %v2289_v2 = vpop.f32.mrb[16].mxu1  ;;  %v1094_v33 = vsub.f32 0.0, %v2294_v9 }
 0x103   :  { %v1762_v63 = vpop.eup %1761  ;;  %v1402_v41 = vmul.f32 %v1760_v59, %v2181_v40  ;;  %1781 = vrcp.f32 %v1247_v53  ;;  %v2296_v40 = vpop.f32.mrb[17].mxu0 }
 0x104   :  { %v1764_v39 = vpop.eup %1763  ;;  %1434 = vst [vmem:[#allocation3 + $0x10] sm:$0xff] %v1370_v60  ;;  %v1368_v3 = vmul.f32 %v1762_v63, %v2184_v43  ;;  %1783 = vpow2.f32 %v1190_v13  ;;  %v2298_v10 = vpop.f32.mrb[17].mxu1  ;;  %v1130_v60 = vmul.f32 1.442695, %v1057_v19 }
 0x105   :  { %v1766_v5 = vpop.eup %1765  ;;  %1466 = vst [vmem:[#allocation3 + $0x110] sm:$0xff] %v1402_v41  ;;  %v1400_v14 = vmul.f32 %v1764_v39, %v2187_v44  ;;  %1785 = vpow2.f32 %v1122_v20  ;;  %v2302_v21 = vpop.f32.mrb[18].mxu0 }
 0x106   :  { %v2304_v43 = vpop.f32.mrb[18].mxu1  ;;  %v1768_v13 = vpop.eup %1767  ;;  %1432 = vst [vmem:[#allocation3] sm:$0xff] %v1368_v3  ;;  %v1371_v8 = vmul.f32 %v1766_v5, %v2192_v49  ;;  %1787 = vpow2.f32 %v1186_v26  ;;  %v1198_v26 = vmul.f32 1.442695, %v1091_v52  ;;  %v1204_v3 = vmul.f32 1.442695, %v1094_v33 }
 0x107   :  { %v2308_v30 = vpop.f32.mrb[19].mxu0  ;;  %v2310_v32 = vpop.f32.mrb[19].mxu1  ;;  %1464 = vst [vmem:[#allocation3 + $0x100] sm:$0xff] %v1400_v14  ;;  %v1403_v20 = vmul.f32 %v1768_v13, %v2195_v50  ;;  %1789 = vpow2.f32 %v1132_v48  ;;  %v1194_v48 = vmul.f32 1.442695, %v1089_v25  ;;  %v2357_v33 = vadd.f32 %v2175_v36, %v2263_v28 }
 0x108   :  { %v1770_v44 = vpop.eup %1769  ;;  %1435 = vst [vmem:[#allocation3 + $0x18] sm:$0xff] %v1371_v8  ;;  %1791 = vpow2.f32 %v1196_v54  ;;  %v1140_v54 = vmul.f32 1.442695, %v1062_v42 }
 0x109   :  { %v1772_v45 = vpop.eup %1771  ;;  %v1369_v49 = vmul.f32 %v1770_v44, %v2200_v55  ;;  %1467 = vst [vmem:[#allocation3 + $0x118] sm:$0xff] %v1403_v20  ;;  %1793 = vpow2.f32 %v1128_v18  ;;  %v2319_v41 = vpop.f32.mrb[20].mxu0  ;;  %v2344_v44 = vadd.f32 %v2175_v36, %v2253_v16 }
 0x10a   :  { %v1774_v53 = vpop.eup %1773  ;;  %v1401_v59 = vmul.f32 %v1772_v45, %v2203_v56  ;;  %1795 = vpow2.f32 %v1192_v24  ;;  %v2321_v0 = vpop.f32.mrb[20].mxu1  ;;  %v2352_v45 = vadd.f32 %v2258_v23, %v2175_v36 }
 0x10b   :  { %v1776_v38 = vpop.eup %1775  ;;  %1433 = vst [vmem:[#allocation3 + $0x8] sm:$0xff] %v1369_v49  ;;  %v1374_v50 = vmul.f32 %v1774_v53, %v2210_v6  ;;  %1797 = vpow2.f32 %v1134_v34  ;;  %v2324_v52 = vpop.f32.mrb[21].mxu0 }
 0x10c   :  { %v1778_v63 = vpop.eup %1777  ;;  %1465 = vst [vmem:[#allocation3 + $0x108] sm:$0xff] %v1401_v59  ;;  %v1406_v55 = vmul.f32 %v1776_v38, %v2213_v7  ;;  %1799 = vpow2.f32 %v1198_v26  ;;  %v2326_v6 = vpop.f32.mrb[21].mxu1  ;;  %v1092_v59 = vsub.f32 0.0, %v2344_v44 }
 0x10d   :  { %v1780_v39 = vpop.eup %1779  ;;  %1438 = vst [vmem:[#allocation3 + $0x30] sm:$0xff] %v1374_v50  ;;  %v1372_v56 = vmul.f32 %v1778_v63, %v2216_v11  ;;  %1801 = vpow2.f32 %v1130_v60  ;;  %v2329_v14 = vpop.f32.mrb[22].mxu0  ;;  %v2336_v11 = vadd.f32 %v2175_v36, %v2251_v15  ;;  %v2348_v15 = vadd.f32 %v2256_v22, %v2175_v36 }
 0x10e   :  { %v1782_v5 = vpop.eup %1781  ;;  %1470 = vst [vmem:[#allocation3 + $0x130] sm:$0xff] %v1406_v55  ;;  %v1404_v7 = vmul.f32 %v1780_v39, %v2219_v12  ;;  %v2331_v18 = vpop.f32.mrb[22].mxu1  ;;  %1803 = vpow2.f32 %v1194_v48  ;;  %v1095_v39 = vsub.f32 0.0, %v2352_v45 }
 0x10f   :  { %v1784_v19 = vpop.eup %1783  ;;  %1436 = vst [vmem:[#allocation3 + $0x20] sm:$0xff] %v1372_v56  ;;  %v1375_v13 = vmul.f32 %v1782_v5, %v2224_v17  ;;  %v2338_v8 = vpop.f32.mrb[23].mxu0  ;;  %1805 = vpow2.f32 %v1140_v54  ;;  %v1060_v16 = vsub.f32 0.0, %v2336_v11  ;;  %v1063_v48 = vsub.f32 0.0, %v2348_v15 }
 0x110   :  { %v2340_v24 = vpop.f32.mrb[23].mxu1  ;;  %v1786_v25 = vpop.eup %1785  ;;  %1468 = vst [vmem:[#allocation3 + $0x120] sm:$0xff] %v1404_v7  ;;  %v1279_v12 = vadd.f32 1.0, %v1784_v19  ;;  %1807 = vpow2.f32 %v1204_v3 }
 0x111   :  { %v1788_v20 = vpop.eup %1787  ;;  %1439 = vst [vmem:[#allocation3 + $0x38] sm:$0xff] %v1375_v13  ;;  %v1245_v17 = vadd.f32 1.0, %v1786_v25  ;;  %v2360_v60 = vpop.f32.mrb[24].mxu0  ;;  %v1136_v19 = vmul.f32 1.442695, %v1060_v16  ;;  %v1061_v13 = vsub.f32 0.0, %v2357_v33  ;;  %v2385_v16 = vadd.f32 %v2287_v47, %v2175_v36 }
 0x112   :  { %v1790_v34 = vpop.eup %1789  ;;  %1809 = vrcp.f32 %v1279_v12  ;;  %v1277_v42 = vadd.f32 1.0, %v1788_v20  ;;  %v2362_v38 = vpop.f32.mrb[24].mxu1 }
 0x113   :  { %v1792_v49 = vpop.eup %1791  ;;  %1811 = vrcp.f32 %v1245_v17  ;;  %v1250_v26 = vadd.f32 1.0, %v1790_v34  ;;  %v2365_v63 = vpop.f32.mrb[25].mxu0  ;;  %v1200_v34 = vmul.f32 1.442695, %v1092_v59 }
 0x114   :  { %v1794_v53 = vpop.eup %1793  ;;  %1813 = vrcp.f32 %v1277_v42  ;;  %v1282_v22 = vadd.f32 1.0, %v1792_v49  ;;  %v2367_v55 = vpop.f32.mrb[25].mxu1  ;;  %v2381_v42 = vadd.f32 %v2175_v36, %v2265_v29 }
 0x115   :  { %v1796_v23 = vpop.eup %1795  ;;  %1815 = vrcp.f32 %v1250_v26  ;;  %v1248_v50 = vadd.f32 1.0, %v1794_v53  ;;  %v2370_v56 = vpop.f32.mrb[26].mxu0  ;;  %v1142_v53 = vmul.f32 1.442695, %v1063_v48 }
 0x116   :  { %v1798_v28 = vpop.eup %1797  ;;  %1817 = vrcp.f32 %v1282_v22  ;;  %v1280_v54 = vadd.f32 1.0, %v1796_v23  ;;  %v2372_v3 = vpop.f32.mrb[26].mxu1 }
 0x117   :  { %v1800_v5 = vpop.eup %1799  ;;  %1819 = vrcp.f32 %v1248_v50  ;;  %v1251_v7 = vadd.f32 1.0, %v1798_v28  ;;  %v2375_v25 = vpop.f32.mrb[27].mxu0  ;;  %v1206_v50 = vmul.f32 1.442695, %v1095_v39  ;;  %v2389_v28 = vadd.f32 %v2289_v2, %v2175_v36 }
 0x118   :  { %v2377_v12 = vpop.f32.mrb[27].mxu1  ;;  %v1802_v20 = vpop.eup %1801  ;;  %1821 = vrcp.f32 %v1280_v54  ;;  %v1283_v17 = vadd.f32 1.0, %v1800_v5  ;;  %v1138_v54 = vmul.f32 1.442695, %v1061_v13  ;;  %v2393_v5 = vadd.f32 %v2175_v36, %v2296_v40 }
 0x119   :  { %v1804_v49 = vpop.eup %1803  ;;  %1823 = vrcp.f32 %v1251_v7  ;;  %v1249_v26 = vadd.f32 1.0, %v1802_v20  ;;  %v1093_v7 = vsub.f32 0.0, %v2381_v42  ;;  %v2398_v39 = vadd.f32 %v2175_v36, %v2298_v10  ;;  %v2400_v20 = vpop.f32.mrb[28].mxu0 }
 0x11a   :  { %v1806_v22 = vpop.eup %1805  ;;  %1825 = vrcp.f32 %v1283_v17  ;;  %v1281_v23 = vadd.f32 1.0, %v1804_v49  ;;  %v2402_v2 = vpop.f32.mrb[28].mxu1  ;;  %v1066_v40 = vsub.f32 0.0, %v2385_v16  ;;  %v2408_v49 = vadd.f32 %v2302_v21, %v2175_v36 }
 0x11b   :  { %v1808_v59 = vpop.eup %1807  ;;  %1827 = vrcp.f32 %v1249_v26  ;;  %v1254_v29 = vadd.f32 1.0, %v1806_v22  ;;  %2620 = vst [vmem:[#allocation6_spill] sm:$0xff] %v2402_v2  ;;  %v2410_v26 = vpop.f32.mrb[29].mxu0 }
 0x11c   :  { %v1810_v48 = vpop.eup %1809  ;;  %1829 = vrcp.f32 %v1281_v23  ;;  %v1286_v47 = vadd.f32 1.0, %v1808_v59  ;;  %2621 = vst [vmem:[#allocation7_spill] sm:$0xff] %v2410_v26  ;;  %v2412_v22 = vpop.f32.mrb[29].mxu1  ;;  %v1098_v59 = vsub.f32 0.0, %v2389_v28 }
 0x11d   :  { %v1812_v17 = vpop.eup %1811  ;;  %v1407_v13 = vmul.f32 %v1810_v48, %v2230_v31  ;;  %1831 = vrcp.f32 %v1254_v29  ;;  %2622 = vst [vmem:[#allocation8_spill] sm:$0xff] %v2412_v22  ;;  %v2418_v31 = vadd.f32 %v2304_v43, %v2175_v36  ;;  %v2420_v29 = vpop.f32.mrb[30].mxu0  ;;  %v1064_v22 = vsub.f32 0.0, %v2393_v5 }
 0x11e   :  { %v1814_v10 = vpop.eup %1813  ;;  %v1373_v23 = vmul.f32 %v1812_v17, %v2233_v37  ;;  %1833 = vrcp.f32 %v1286_v47  ;;  %2623 = vst [vmem:[#allocation9_spill] sm:$0xff] %v2420_v29  ;;  %v2422_v48 = vpop.f32.mrb[30].mxu1  ;;  %v2428_v37 = vadd.f32 %v2175_v36, %v2308_v30  ;;  %v1067_v30 = vsub.f32 0.0, %v2408_v49 }
 0x11f   :  { %2624 = vst [vmem:[#allocation10_spill] sm:$0xff] %v2422_v48  ;;  %v1816_v21 = vpop.eup %1815  ;;  %1471 = vst [vmem:[#allocation3 + $0x138] sm:$0xff] %v1407_v13  ;;  %v1405_v26 = vmul.f32 %v1814_v10, %v2236_v46  ;;  %1835 = vpow2.f32 %v1136_v19  ;;  %v2430_v47 = vpop.f32.mrb[31].mxu0  ;;  %v1202_v48 = vmul.f32 1.442695, %v1093_v7  ;;  %v1096_v13 = vsub.f32 0.0, %v2398_v39 }
 0x120   :  { %v2432_v17 = vpop.f32.mrb[31].mxu1  ;;  %v1818_v43 = vpop.eup %1817  ;;  %1437 = vst [vmem:[#allocation3 + $0x28] sm:$0xff] %v1373_v23  ;;  %v1378_v29 = vmul.f32 %v1816_v21, %v2240_v58  ;;  %1837 = vpow2.f32 %v1200_v34  ;;  %v1148_v10 = vmul.f32 1.442695, %v1066_v40  ;;  %v1212_v23 = vmul.f32 1.442695, %v1098_v59 }
 0x121   :  { %2625 = vst [vmem:[#allocation11_spill] sm:$0xff] %v2432_v17  ;;  %v1820_v46 = vpop.eup %1819  ;;  %1469 = vst [vmem:[#allocation3 + $0x128] sm:$0xff] %v1405_v26  ;;  %v1410_v19 = vmul.f32 %v1818_v43, %v2244_v62  ;;  %1839 = vpow2.f32 %v1142_v53  ;;  %v1099_v58 = vsub.f32 0.0, %v2418_v31  ;;  %v1144_v26 = vmul.f32 1.442695, %v1064_v22 }
 0x122   :  { %v1822_v2 = vpop.eup %1821  ;;  %1442 = vst [vmem:[#allocation3 + $0x50] sm:$0xff] %v1378_v29  ;;  %v1376_v17 = vmul.f32 %v1820_v46, %v2248_v4  ;;  %1841 = vpow2.f32 %v1206_v50  ;;  %v1065_v62 = vsub.f32 0.0, %v2428_v37  ;;  %v1208_v29 = vmul.f32 1.442695, %v1096_v13 }
 0x123   :  { %v1824_v34 = vpop.eup %1823  ;;  %1474 = vst [vmem:[#allocation3 + $0x150] sm:$0xff] %v1410_v19  ;;  %v1408_v7 = vmul.f32 %v1822_v2, %v2261_v27  ;;  %1843 = vpow2.f32 %v1138_v54  ;;  %v1150_v50 = vmul.f32 1.442695, %v1067_v30  ;;  %v1214_v54 = vmul.f32 1.442695, %v1099_v58 }
 0x124   :  { %v1826_v53 = vpop.eup %1825  ;;  %1440 = vst [vmem:[#allocation3 + $0x40] sm:$0xff] %v1376_v17  ;;  %v1379_v40 = vmul.f32 %v1824_v34, %v2269_v35  ;;  %1845 = vpow2.f32 %v1202_v48  ;;  %v1146_v35 = vmul.f32 1.442695, %v1065_v62  ;;  %v2462_v30 = vadd.f32 %v2175_v36, %v2324_v52 }
 0x125   :  { %v1828_v21 = vpop.eup %1827  ;;  %1472 = vst [vmem:[#allocation3 + $0x140] sm:$0xff] %v1408_v7  ;;  %v1411_v4 = vmul.f32 %v1826_v53, %v2272_v51  ;;  %1847 = vpow2.f32 %v1148_v10  ;;  %v2467_v34 = vadd.f32 %v2175_v36, %v2326_v6 }
 0x126   :  { %v1830_v59 = vpop.eup %1829  ;;  %1443 = vst [vmem:[#allocation3 + $0x58] sm:$0xff] %v1379_v40  ;;  %v1377_v27 = vmul.f32 %v1828_v21, %v2275_v57  ;;  %1849 = vpow2.f32 %v1212_v23  ;;  %v2450_v57 = vadd.f32 %v2175_v36, %v2310_v32  ;;  %v1068_v21 = vsub.f32 0.0, %v2462_v30 }
 0x127   :  { %v1832_v2 = vpop.eup %1831  ;;  %1475 = vst [vmem:[#allocation3 + $0x158] sm:$0xff] %v1411_v4  ;;  %v1409_v22 = vmul.f32 %v1830_v59, %v2280_v61  ;;  %1851 = vpow2.f32 %v1144_v26  ;;  %v2454_v61 = vadd.f32 %v2319_v41, %v2175_v36  ;;  %v1100_v59 = vsub.f32 0.0, %v2467_v34 }
 0x128   :  { %v1834_v48 = vpop.eup %1833  ;;  %1441 = vst [vmem:[#allocation3 + $0x48] sm:$0xff] %v1377_v27  ;;  %v1382_v17 = vmul.f32 %v1832_v2, %v2285_v1  ;;  %1853 = vpow2.f32 %v1208_v29  ;;  %v1097_v41 = vsub.f32 0.0, %v2450_v57 }
 0x129   :  { %v1836_v51 = vpop.eup %1835  ;;  %1473 = vst [vmem:[#allocation3 + $0x148] sm:$0xff] %v1409_v22  ;;  %v1414_v43 = vmul.f32 %v1834_v48, %v2294_v9  ;;  %1855 = vpow2.f32 %v1150_v50  ;;  %v2458_v9 = vadd.f32 %v2321_v0, %v2175_v36  ;;  %v1070_v26 = vsub.f32 0.0, %v2454_v61 }
 0x12a   :  { %v1838_v13 = vpop.eup %1837  ;;  %1446 = vst [vmem:[#allocation3 + $0x70] sm:$0xff] %v1382_v17  ;;  %v1252_v46 = vadd.f32 1.0, %v1836_v51  ;;  %1857 = vpow2.f32 %v1214_v54  ;;  %v1210_v6 = vmul.f32 1.442695, %v1097_v41  ;;  %v2475_v22 = vadd.f32 %v2329_v14, %v2175_v36 }
 0x12b   :  { %v1840_v19 = vpop.eup %1839  ;;  %1478 = vst [vmem:[#allocation3 + $0x170] sm:$0xff] %v1414_v43  ;;  %v1284_v1 = vadd.f32 1.0, %v1838_v13  ;;  %1859 = vpow2.f32 %v1146_v35  ;;  %v1102_v52 = vsub.f32 0.0, %v2458_v9  ;;  %v1156_v2 = vmul.f32 1.442695, %v1070_v26 }
 0x12c   :  { %v1842_v10 = vpop.eup %1841  ;;  %1861 = vrcp.f32 %v1252_v46  ;;  %v1255_v32 = vadd.f32 1.0, %v1840_v19  ;;  %v2479_v51 = vadd.f32 %v2331_v18, %v2175_v36  ;;  %v1152_v46 = vmul.f32 1.442695, %v1068_v21 }
 0x12d   :  { %v1844_v23 = vpop.eup %1843  ;;  %1863 = vrcp.f32 %v1284_v1  ;;  %v1287_v58 = vadd.f32 1.0, %v1842_v10  ;;  %v1220_v17 = vmul.f32 1.442695, %v1102_v52  ;;  %v2483_v19 = vadd.f32 %v2175_v36, %v2338_v8 }
 0x12e   :  { %v1846_v7 = vpop.eup %1845  ;;  %1865 = vrcp.f32 %v1255_v32  ;;  %v1253_v0 = vadd.f32 1.0, %v1844_v23  ;;  %v1216_v10 = vmul.f32 1.442695, %v1100_v59  ;;  %v2487_v32 = vadd.f32 %v2175_v36, %v2340_v24 }
 0x12f   :  { %v1848_v62 = vpop.eup %1847  ;;  %1867 = vrcp.f32 %v1287_v58  ;;  %v1285_v53 = vadd.f32 1.0, %v1846_v7  ;;  %v1071_v58 = vsub.f32 0.0, %v2475_v22  ;;  %v2492_v41 = vadd.f32 %v2360_v60, %v2175_v36 }
 0x130   :  { %v1850_v40 = vpop.eup %1849  ;;  %1869 = vrcp.f32 %v1253_v0  ;;  %v1258_v29 = vadd.f32 1.0, %v1848_v62  ;;  %v1103_v0 = vsub.f32 0.0, %v2479_v51  ;;  %v2498_v26 = vadd.f32 %v2362_v38, %v2175_v36 }
 0x131   :  { %v1852_v4 = vpop.eup %1851  ;;  %1871 = vrcp.f32 %v1285_v53  ;;  %v1290_v50 = vadd.f32 1.0, %v1850_v40  ;;  %v1069_v53 = vsub.f32 0.0, %v2483_v19  ;;  %v2504_v60 = vadd.f32 %v2175_v36, %v2365_v63 }
 0x132   :  { %v1854_v27 = vpop.eup %1853  ;;  %1873 = vrcp.f32 %v1258_v29  ;;  %v1256_v54 = vadd.f32 1.0, %v1852_v4  ;;  %v1101_v40 = vsub.f32 0.0, %v2487_v32  ;;  %v2510_v38 = vadd.f32 %v2175_v36, %v2367_v55 }
 0x133   :  { %v1856_v35 = vpop.eup %1855  ;;  %1875 = vrcp.f32 %v1290_v50  ;;  %v1288_v48 = vadd.f32 1.0, %v1854_v27  ;;  %v1158_v21 = vmul.f32 1.442695, %v1071_v58  ;;  %v1074_v63 = vsub.f32 0.0, %v2492_v41 }
 0x134   :  { %v1858_v43 = vpop.eup %1857  ;;  %1877 = vrcp.f32 %v1256_v54  ;;  %v1259_v13 = vadd.f32 1.0, %v1856_v35  ;;  %v1154_v27 = vmul.f32 1.442695, %v1069_v53  ;;  %v1218_v35 = vmul.f32 1.442695, %v1101_v40 }
 0x135   :  { %v1860_v1 = vpop.eup %1859  ;;  %1879 = vrcp.f32 %v1288_v48  ;;  %v1291_v14 = vadd.f32 1.0, %v1858_v43  ;;  %v1164_v43 = vmul.f32 1.442695, %v1074_v63 }
 0x136   :  { %v1862_v23 = vpop.eup %1861  ;;  %1881 = vrcp.f32 %v1259_v13  ;;  %v1257_v18 = vadd.f32 1.0, %v1860_v1 }
 0x137   :  { %v1864_v7 = vpop.eup %1863  ;;  %v1380_v8 = vmul.f32 %v1862_v23, %v2336_v11  ;;  %1883 = vrcp.f32 %v1291_v14 }
 0x138   :  { %v1866_v24 = vpop.eup %1865  ;;  %v1412_v62 = vmul.f32 %v1864_v7, %v2344_v44  ;;  %1885 = vrcp.f32 %v1257_v18 }
 0x139   :  { %v1868_v52 = vpop.eup %1867  ;;  %1444 = vst [vmem:[#allocation3 + $0x60] sm:$0xff] %v1380_v8  ;;  %v1383_v11 = vmul.f32 %v1866_v24, %v2348_v15  ;;  %1887 = vpow2.f32 %v1210_v6  ;;  %v1222_v15 = vmul.f32 1.442695, %v1103_v0  ;;  %v1106_v6 = vsub.f32 0.0, %v2498_v26 }
 0x13a   :  { %v1870_v29 = vpop.eup %1869  ;;  %1476 = vst [vmem:[#allocation3 + $0x160] sm:$0xff] %v1412_v62  ;;  %v1415_v44 = vmul.f32 %v1868_v52, %v2352_v45  ;;  %1889 = vpow2.f32 %v1156_v2  ;;  %v1072_v45 = vsub.f32 0.0, %v2504_v60 }
 0x13b   :  { %v1872_v4 = vpop.eup %1871  ;;  %1447 = vst [vmem:[#allocation3 + $0x78] sm:$0xff] %v1383_v11  ;;  %v1381_v50 = vmul.f32 %v1870_v29, %v2357_v33  ;;  %1891 = vpow2.f32 %v1220_v17  ;;  %v1104_v33 = vsub.f32 0.0, %v2510_v38 }
 0x13c   :  { %v1874_v59 = vpop.eup %1873  ;;  %1479 = vst [vmem:[#allocation3 + $0x178] sm:$0xff] %v1415_v44  ;;  %v1413_v55 = vmul.f32 %v1872_v4, %v2381_v42  ;;  %1893 = vpow2.f32 %v1152_v46  ;;  %v1228_v46 = vmul.f32 1.442695, %v1106_v6  ;;  %v1160_v14 = vmul.f32 1.442695, %v1072_v45 }
 0x13d   :  { %v1876_v54 = vpop.eup %1875  ;;  %1445 = vst [vmem:[#allocation3 + $0x68] sm:$0xff] %v1381_v50  ;;  %v1386_v2 = vmul.f32 %v1874_v59, %v2385_v16  ;;  %1895 = vpow2.f32 %v1216_v10 }
 0x13e   :  { %v1878_v48 = vpop.eup %1877  ;;  %1477 = vst [vmem:[#allocation3 + $0x168] sm:$0xff] %v1413_v55  ;;  %v1418_v17 = vmul.f32 %v1876_v54, %v2389_v28  ;;  %1897 = vpow2.f32 %v1158_v21  ;;  %v1224_v28 = vmul.f32 1.442695, %v1104_v33 }
 0x13f   :  { %v1880_v13 = vpop.eup %1879  ;;  %1450 = vst [vmem:[#allocation3 + $0x90] sm:$0xff] %v1386_v2  ;;  %v1384_v42 = vmul.f32 %v1878_v48, %v2393_v5  ;;  %1899 = vpow2.f32 %v1222_v15  ;;  %v2626_v2 = vld [vmem:[#allocation6_spill] sm:$0xff] }
 0x140   :  { %v1882_v1 = vpop.eup %1881  ;;  %1482 = vst [vmem:[#allocation3 + $0x190] sm:$0xff] %v1418_v17  ;;  %v1416_v16 = vmul.f32 %v1880_v13, %v2398_v39  ;;  %1901 = vpow2.f32 %v1154_v27  ;;  %v2528_v39 = vadd.f32 %v2370_v56, %v2175_v36 }
 0x141   :  { %v1884_v10 = vpop.eup %1883  ;;  %1448 = vst [vmem:[#allocation3 + $0x80] sm:$0xff] %v1384_v42  ;;  %v1387_v23 = vmul.f32 %v1882_v1, %v2408_v49  ;;  %1903 = vpow2.f32 %v1218_v35  ;;  %v2532_v49 = vadd.f32 %v2372_v3, %v2175_v36 }
 0x142   :  { %v1886_v18 = vpop.eup %1885  ;;  %1480 = vst [vmem:[#allocation3 + $0x180] sm:$0xff] %v1416_v16  ;;  %v1419_v58 = vmul.f32 %v1884_v10, %v2418_v31  ;;  %1905 = vpow2.f32 %v1164_v43  ;;  %v1075_v3 = vsub.f32 0.0, %v2528_v39  ;;  %v2627_v43 = vld [vmem:[#allocation7_spill] sm:$0xff] }
 0x143   :  { %v1888_v5 = vpop.eup %1887  ;;  %1451 = vst [vmem:[#allocation3 + $0x98] sm:$0xff] %v1387_v23  ;;  %v1385_v7 = vmul.f32 %v1886_v18, %v2428_v37  ;;  %1907 = vpow2.f32 %v1228_v46  ;;  %v1987_v37 = vld [vmem:[%s2618_s2] ss:$0 sm:$0xff]  ;;  %v1107_v44 = vsub.f32 0.0, %v2532_v49  ;;  %s2012_s2 = smov [#allocation3]  }
 0x144   :  { %v1890_v8 = vpop.eup %1889  ;;  %1483 = vst [vmem:[#allocation3 + $0x198] sm:$0xff] %v1419_v58  ;;  %v1289_v0 = vadd.f32 1.0, %v1888_v5  ;;  %1909 = vpow2.f32 %v1160_v14  ;;  %v2538_v62 = vadd.f32 %v1987_v37, %v2375_v25  ;;  %v2541_v52 = vadd.f32 %v1987_v37, %v2377_v12  ;;  %s1501_s28 = sshll.u32 %s2012_s2, 4  ;;  %s1502_s28 = int_to_ptr.vmem [resolvable:$true] %s1501_s28 }
 0x145   :  { %v1892_v24 = vpop.eup %1891  ;;  %1449 = vst [vmem:[#allocation3 + $0x88] sm:$0xff] %v1385_v7  ;;  %v1262_v31 = vadd.f32 1.0, %v1890_v8  ;;  %1911 = vpow2.f32 %v1224_v28  ;;  %v1166_v59 = vmul.f32 1.442695, %v1075_v3  ;;  %v2548_v55 = vadd.f32 %v1987_v37, %v2400_v20  ;;  %v2628_v20 = vld [vmem:[#allocation8_spill] sm:$0xff]  ;;  %v2629_v28 = vld [vmem:[#allocation9_spill] sm:$0xff]  ;;  %p1993_p1 = scmp.lt.s32.totalorder %s1502_s28, %s1502_s28 }
 0x146   :  { %v1894_v56 = vpop.eup %1893  ;;  %1913 = vrcp.f32 %v1289_v0  ;;  %v1294_v53 = vadd.f32 1.0, %v1892_v24  ;;  %v1073_v63 = vsub.f32 0.0, %v2538_v62  ;;  %v1105_v12 = vsub.f32 0.0, %v2541_v52  ;;  %v2630_v8 = vld [vmem:[#allocation10_spill] sm:$0xff]  ;;  %s1988_s29 = scalar_lea.vmem %s1502_s28, 8192 }
 0x147   :  { %v1896_v11 = vpop.eup %1895  ;;  %1915 = vrcp.f32 %v1262_v31  ;;  %v1260_v36 = vadd.f32 1.0, %v1894_v56  ;;  %v1230_v54 = vmul.f32 1.442695, %v1107_v44  ;;  %v2551_v35 = vadd.f32 %v1987_v37, %v2626_v2  ;;  %p1989_p0 = scmp.ne.s32.totalorder %s1502_s28, %s1988_s29  ;;  %p1994_p2 = scmp.lt.s32.totalorder %s1988_s29, %s1988_s29 }
 0x148   :  { %v1898_v40 = vpop.eup %1897  ;;  %1917 = vrcp.f32 %v1294_v53  ;;  %v1292_v29 = vadd.f32 1.0, %v1896_v11  ;;  %v1162_v17 = vmul.f32 1.442695, %v1073_v63  ;;  %v2554_v13 = vadd.f32 %v1987_v37, %v2627_v43 }
 0x149   :  { %v1900_v21 = vpop.eup %1899  ;;  %1919 = vrcp.f32 %v1260_v36  ;;  %v1263_v25 = vadd.f32 1.0, %v1898_v40  ;;  %v1226_v1 = vmul.f32 1.442695, %v1105_v12  ;;  %v2557_v16 = vadd.f32 %v1987_v37, %v2628_v20  ;;  %v2631_v40 = vld [vmem:[#allocation11_spill] sm:$0xff]  ;;  %p1995_p3 = por %p1994_p2, %p1993_p1 }
 0x14a   :  { %v1902_v4 = vpop.eup %1901  ;;  %1921 = vrcp.f32 %v1292_v29  ;;  %v1295_v50 = vadd.f32 1.0, %v1900_v21  ;;  %v1078_v23 = vsub.f32 0.0, %v2548_v55  ;;  %v2561_v18 = vadd.f32 %v1987_v37, %v2629_v28 }
 0x14b   :  { %v1904_v15 = vpop.eup %1903  ;;  %1923 = vrcp.f32 %v1263_v25  ;;  %v1261_v6 = vadd.f32 1.0, %v1902_v4  ;;  %v1110_v7 = vsub.f32 0.0, %v2551_v35  ;;  %v2565_v0 = vadd.f32 %v1987_v37, %v2630_v8  ;;  %p1996_p4 = pnand %p1995_p3, %p1989_p0 }
 0x14c   :  { %v1906_v27 = vpop.eup %1905  ;;  %1925 = vrcp.f32 %v1295_v50  ;;  %v1293_v45 = vadd.f32 1.0, %v1904_v15  ;;  %v1076_v56 = vsub.f32 0.0, %v2554_v13  ;;  %v2570_v53 = vadd.f32 %v1987_v37, %v2430_v47 }
 0x14d   :  { %v1908_v33 = vpop.eup %1907  ;;  %1927 = vrcp.f32 %v1261_v6  ;;  %v1266_v48 = vadd.f32 1.0, %v1906_v27  ;;  %v1108_v3 = vsub.f32 0.0, %v2557_v16  ;;  %v2575_v29 = vadd.f32 %v1987_v37, %v2631_v40 }
 0x14e   :  { %v1910_v42 = vpop.eup %1909  ;;  %1929 = vrcp.f32 %v1293_v45  ;;  %v1298_v46 = vadd.f32 1.0, %v1908_v33  ;;  %v1079_v25 = vsub.f32 0.0, %v2561_v18  ;;  %v1111_v4 = vsub.f32 0.0, %v2565_v0 }
 0x14f   :  { %v1912_v14 = vpop.eup %1911  ;;  %1931 = vrcp.f32 %v1266_v48  ;;  %v1264_v10 = vadd.f32 1.0, %v1910_v42  ;;  %v1168_v12 = vmul.f32 1.442695, %v1076_v56 }
 0x150   :  { %v1914_v58 = vpop.eup %1913  ;;  %1933 = vrcp.f32 %v1298_v46  ;;  %v1296_v5 = vadd.f32 1.0, %v1912_v14  ;;  %v1238_v33 = vmul.f32 1.442695, %v1111_v4 }
 0x151   :  { %v1916_v24 = vpop.eup %1915  ;;  %v1417_v31 = vmul.f32 %v1914_v58, %v2450_v57  ;;  %1935 = vrcp.f32 %v1264_v10  ;;  %v1172_v57 = vmul.f32 1.442695, %v1078_v23 }
 0x152   :  { %v1918_v11 = vpop.eup %1917  ;;  %v1390_v36 = vmul.f32 %v1916_v24, %v2454_v61  ;;  %1937 = vrcp.f32 %v1296_v5  ;;  %v1236_v61 = vmul.f32 1.442695, %v1110_v7 }
 0x153   :  { %v1920_v44 = vpop.eup %1919  ;;  %1481 = vst [vmem:[#allocation3 + $0x188] sm:$0xff] %v1417_v31  ;;  %v1422_v21 = vmul.f32 %v1918_v11, %v2458_v9  ;;  %1939 = vpow2.f32 %v1166_v59  ;;  %v1077_v9 = vsub.f32 0.0, %v2570_v53  ;;  %v1232_v59 = vmul.f32 1.442695, %v1108_v3 }
 0x154   :  { %v1922_v63 = vpop.eup %1921  ;;  %1454 = vst [vmem:[#allocation3 + $0xb0] sm:$0xff] %v1390_v36  ;;  %v1388_v47 = vmul.f32 %v1920_v44, %v2462_v30  ;;  %1941 = vpow2.f32 %v1230_v54  ;;  %v1109_v30 = vsub.f32 0.0, %v2575_v29  ;;  %v1174_v54 = vmul.f32 1.442695, %v1079_v25 }
 0x155   :  { %v1924_v50 = vpop.eup %1923  ;;  %1486 = vst [vmem:[#allocation3 + $0x1b0] sm:$0xff] %v1422_v21  ;;  %v1420_v37 = vmul.f32 %v1922_v63, %v2467_v34  ;;  %1943 = vpow2.f32 %v1162_v17  ;;  %v1170_v17 = vmul.f32 1.442695, %v1077_v9 }
 0x156   :  { %v1926_v15 = vpop.eup %1925  ;;  %1452 = vst [vmem:[#allocation3 + $0xa0] sm:$0xff] %v1388_v47  ;;  %v1391_v6 = vmul.f32 %v1924_v50, %v2475_v22  ;;  %1945 = vpow2.f32 %v1226_v1 }
 0x157   :  { %v1928_v27 = vpop.eup %1927  ;;  %1484 = vst [vmem:[#allocation3 + $0x1a0] sm:$0xff] %v1420_v37  ;;  %v1423_v45 = vmul.f32 %v1926_v15, %v2479_v51  ;;  %1947 = vpow2.f32 %v1172_v57  ;;  %v1234_v51 = vmul.f32 1.442695, %v1109_v30 }
 0x158   :  { %v1930_v2 = vpop.eup %1929  ;;  %1455 = vst [vmem:[#allocation3 + $0xb8] sm:$0xff] %v1391_v6  ;;  %v1389_v34 = vmul.f32 %v1928_v27, %v2483_v19  ;;  %1949 = vpow2.f32 %v1236_v61 }
 0x159   :  { %v1932_v48 = vpop.eup %1931  ;;  %1487 = vst [vmem:[#allocation3 + $0x1b8] sm:$0xff] %v1423_v45  ;;  %v1421_v22 = vmul.f32 %v1930_v2, %v2487_v32  ;;  %1951 = vpow2.f32 %v1168_v12 }
 0x15a   :  { %v1934_v43 = vpop.eup %1933  ;;  %1453 = vst [vmem:[#allocation3 + $0xa8] sm:$0xff] %v1389_v34  ;;  %v1394_v42 = vmul.f32 %v1932_v48, %v2492_v41  ;;  %1953 = vpow2.f32 %v1232_v59 }
 0x15b   :  { %v1936_v46 = vpop.eup %1935  ;;  %1485 = vst [vmem:[#allocation3 + $0x1a8] sm:$0xff] %v1421_v22  ;;  %v1426_v1 = vmul.f32 %v1934_v43, %v2498_v26  ;;  %1955 = vpow2.f32 %v1174_v54 }
 0x15c   :  { %v1938_v19 = vpop.eup %1937  ;;  %1458 = vst [vmem:[#allocation3 + $0xd0] sm:$0xff] %v1394_v42  ;;  %v1392_v20 = vmul.f32 %v1936_v46, %v2504_v60  ;;  %1957 = vpow2.f32 %v1238_v33 }
 0x15d   :  { %v1940_v14 = vpop.eup %1939  ;;  %1490 = vst [vmem:[#allocation3 + $0x1d0] sm:$0xff] %v1426_v1  ;;  %v1424_v32 = vmul.f32 %v1938_v19, %v2510_v38  ;;  %1959 = vpow2.f32 %v1170_v17 }
 0x15e   :  { %v1942_v10 = vpop.eup %1941  ;;  %1456 = vst [vmem:[#allocation3 + $0xc0] sm:$0xff] %v1392_v20  ;;  %v1267_v41 = vadd.f32 1.0, %v1940_v14  ;;  %1961 = vpow2.f32 %v1234_v51 }
 0x15f   :  { %v1944_v23 = vpop.eup %1943  ;;  %1488 = vst [vmem:[#allocation3 + $0x1c0] sm:$0xff] %v1424_v32  ;;  %v1299_v28 = vadd.f32 1.0, %v1942_v10 }
 0x160   :  { %v1946_v58 = vpop.eup %1945  ;;  %1963 = vrcp.f32 %v1267_v41  ;;  %v1265_v26 = vadd.f32 1.0, %v1944_v23 }
 0x161   :  { %v1948_v5 = vpop.eup %1947  ;;  %1965 = vrcp.f32 %v1299_v28  ;;  %v1297_v7 = vadd.f32 1.0, %v1946_v58 }
 0x162   :  { %v1950_v60 = vpop.eup %1949  ;;  %1967 = vrcp.f32 %v1265_v26  ;;  %v1270_v8 = vadd.f32 1.0, %v1948_v5 }
 0x163   :  { %v1952_v24 = vpop.eup %1951  ;;  %1969 = vrcp.f32 %v1297_v7  ;;  %v1302_v38 = vadd.f32 1.0, %v1950_v60 }
 0x164   :  { %v1954_v31 = vpop.eup %1953  ;;  %1971 = vrcp.f32 %v1270_v8  ;;  %v1268_v56 = vadd.f32 1.0, %v1952_v24 }
 0x165   :  { %v1956_v11 = vpop.eup %1955  ;;  %1973 = vrcp.f32 %v1302_v38  ;;  %v1300_v36 = vadd.f32 1.0, %v1954_v31 }
 0x166   :  { %v1958_v3 = vpop.eup %1957  ;;  %1975 = vrcp.f32 %v1268_v56  ;;  %v1271_v40 = vadd.f32 1.0, %v1956_v11 }
 0x167   :  { %v1960_v44 = vpop.eup %1959  ;;  %1977 = vrcp.f32 %v1300_v36  ;;  %v1303_v21 = vadd.f32 1.0, %v1958_v3 }
 0x168   :  { %v1962_v57 = vpop.eup %1961  ;;  %1979 = vrcp.f32 %v1271_v40  ;;  %v1269_v25 = vadd.f32 1.0, %v1960_v44 }
 0x169   :  { %1981 = vrcp.f32 %v1303_v21  ;;  %v1301_v63 = vadd.f32 1.0, %v1962_v57 }
 0x16a   :  { %v1964_v47 = vpop.eup %1963  ;;  %1983 = vrcp.f32 %v1269_v25 }
 0x16b   :  { %v1966_v61 = vpop.eup %1965  ;;  %v1395_v4 = vmul.f32 %v1964_v47, %v2528_v39  ;;  %1985 = vrcp.f32 %v1301_v63 }
 0x16c   :  { %v1968_v50 = vpop.eup %1967  ;;  %v1427_v37 = vmul.f32 %v1966_v61, %v2532_v49 }
 0x16d   :  { %v1970_v12 = vpop.eup %1969  ;;  %1459 = vst [vmem:[#allocation3 + $0xd8] sm:$0xff] %v1395_v4  ;;  %v1393_v9 = vmul.f32 %v1968_v50, %v2538_v62 }
 0x16e   :  { %v1972_v15 = vpop.eup %1971  ;;  %1491 = vst [vmem:[#allocation3 + $0x1d8] sm:$0xff] %v1427_v37  ;;  %v1425_v6 = vmul.f32 %v1970_v12, %v2541_v52 }
 0x16f   :  { %v1974_v59 = vpop.eup %1973  ;;  %1457 = vst [vmem:[#allocation3 + $0xc8] sm:$0xff] %v1393_v9  ;;  %v1398_v30 = vmul.f32 %v1972_v15, %v2548_v55 }
 0x170   :  { %v1976_v27 = vpop.eup %1975  ;;  %1489 = vst [vmem:[#allocation3 + $0x1c8] sm:$0xff] %v1425_v6  ;;  %v1430_v39 = vmul.f32 %v1974_v59, %v2551_v35 }
 0x171   :  { %v1978_v45 = vpop.eup %1977  ;;  %1462 = vst [vmem:[#allocation3 + $0xf0] sm:$0xff] %v1398_v30  ;;  %v1396_v49 = vmul.f32 %v1976_v27, %v2554_v13 }
 0x172   :  { %v1980_v54 = vpop.eup %1979  ;;  %1494 = vst [vmem:[#allocation3 + $0x1f0] sm:$0xff] %v1430_v39  ;;  %v1428_v62 = vmul.f32 %v1978_v45, %v2557_v16 }
 0x173   :  { %v1982_v2 = vpop.eup %1981  ;;  %1460 = vst [vmem:[#allocation3 + $0xe0] sm:$0xff] %v1396_v49  ;;  %v1399_v52 = vmul.f32 %v1980_v54, %v2561_v18 }
 0x174   :  { %v1984_v34 = vpop.eup %1983  ;;  %1492 = vst [vmem:[#allocation3 + $0x1e0] sm:$0xff] %v1428_v62  ;;  %v1431_v55 = vmul.f32 %v1982_v2, %v2565_v0 }
 0x175   :  { %v1986_v33 = vpop.eup %1985  ;;  %1463 = vst [vmem:[#allocation3 + $0xf8] sm:$0xff] %v1399_v52  ;;  %v1397_v35 = vmul.f32 %v1984_v34, %v2570_v53 }
 0x176   :  { %1495 = vst [vmem:[#allocation3 + $0x1f8] sm:$0xff] %v1431_v55  ;;  %v1429_v13 = vmul.f32 %v1986_v33, %v2575_v29 }
 0x177   :  { %1461 = vst [vmem:[#allocation3 + $0xe8] sm:$0xff] %v1397_v35 }
 0x178   :  { %1493 = vst [vmem:[#allocation3 + $0x1e8] sm:$0xff] %v1429_v13 }
 0x179   :  { %1999 = shalt.err (!%p1996_p4)
}
 0x17a   :  { %s2000_s5 = scalar_lea.hbm %s2619_s3, 8192 }
 0x17b   :  { %p2001_p5 = scmp.ne.s32.totalorder %s2619_s3, %s2000_s5  ;;  %p2004_p6 = scmp.lt.u32.totalorder %s2000_s5, %s2619_s3 }
 0x17d   :  { %p2006_p7 = pnand %p2004_p6, %p2001_p5 }
 0x17f   :  { %2009 = shalt.err (!%p2006_p7)
}
 0x180   :  { %s2013_s10 = smov 128   ;;  %s2014_s11 = smov 8  }
 0x181   :  { %1507 = dma.vmem_to_hbm [thread:$0]  %s1502_s28, 8192, %s2619_s3, [#allocation4], %s2013_s10, %s2013_s10, %s2014_s11  }
 0x182   :  { %2010 = dma.done.wait [#allocation4], 8192  }
 0x183   :  { %2011 = vsyncadd [#allocation4], 4294959104 }
 0x184   :  { %1511 = vsyncpa [#allocation4], 1 }

</bundles_post_ra>
